<compile_context>
chip_gen: v7x
topology: tpu7x:2x2x1
jax: 0.10.0
libtpu: 0.0.40
codegen_flags: <defaults>
</compile_context>

<pallas_src>
import functools

import jax
import jax.numpy as jnp
import numpy as np
from jax import lax
from jax.experimental import pallas as pl
from jax.experimental.pallas import tpu as pltpu

LANE = 128
SUB = 8
ROW_BLOCK = 1024          # pixel rows (of 128 lanes) per input per grid step
_EPS = 1e-8               # matches torch.nn.functional.cosine_similarity eps


# ----------------------------------------------------------------------------
# Kernel
# ----------------------------------------------------------------------------
def _loss_kernel(zh_ref, zg_ref, hx_ref, hy_ref, hz_ref,
                 gx_ref, gy_ref, gz_ref, out_ref, *,
                 hw_rows, row_block, half_blocks):
    i = pl.program_id(0)          # TensorCore half ("parallel")
    b = pl.program_id(1)          # batch image
    j = pl.program_id(2)          # pixel-row block within this half

    @pl.when(jnp.logical_and(b == 0, j == 0))
    def _():
        out_ref[...] = jnp.zeros_like(out_ref)

    # Tail / duplicated-clamped-block mask: global pixel row within the image.
    linear_j = i * half_blocks + j
    row_ids = lax.broadcasted_iota(jnp.int32, zh_ref.shape, 1)
    in_range = (linear_j * row_block + row_ids) < hw_rows

    # ---- depth --------------------------------------------------------
    zh_raw = zh_ref[...].astype(jnp.float32)
    zg_raw = zg_ref[...].astype(jnp.float32)
    d_valid = jnp.logical_and(in_range, jnp.logical_not(jnp.isnan(zg_raw)))
    md = d_valid.astype(jnp.float32)
    zh = jnp.where(d_valid, zh_raw, 0.0)      # where-select: garbage/NaN safe
    zg = jnp.where(d_valid, zg_raw, 0.0)

    # ---- normals ------------------------------------------------------
    hx_raw = hx_ref[...].astype(jnp.float32)
    hy_raw = hy_ref[...].astype(jnp.float32)
    hz_raw = hz_ref[...].astype(jnp.float32)
    gx_raw = gx_ref[...].astype(jnp.float32)
    gy_raw = gy_ref[...].astype(jnp.float32)
    gz_raw = gz_ref[...].astype(jnp.float32)

    g_nan = jnp.isnan(gx_raw) | jnp.isnan(gy_raw) | jnp.isnan(gz_raw)
    n_valid = jnp.logical_and(in_range, jnp.logical_not(g_nan))
    mn = n_valid.astype(jnp.float32)
    hx = jnp.where(n_valid, hx_raw, 0.0)
    hy = jnp.where(n_valid, hy_raw, 0.0)
    hz = jnp.where(n_valid, hz_raw, 0.0)
    gx = jnp.where(n_valid, gx_raw, 0.0)
    gy = jnp.where(n_valid, gy_raw, 0.0)
    gz = jnp.where(n_valid, gz_raw, 0.0)

    dot = hx * gx + hy * gy + hz * gz
    nh2 = hx * hx + hy * hy + hz * hz
    ng2 = gx * gx + gy * gy + gz * gz
    # Single EUP op: cos = dot / max(||h||*||g||, eps).
    cos = dot * lax.rsqrt(jnp.maximum(nh2 * ng2, _EPS * _EPS))
    contrib = jnp.where(n_valid, 1.0 - cos, 0.0)

    # ---- accumulate per-lane partial sums, one (1,LANE) row per quantity ----
    partial_rows = (md, zh, zg, zh * zh, zg * zg, zh * zg, mn, contrib)
    for r, v in enumerate(partial_rows):
        # v: (1, row_block, LANE) -> (1, LANE) sublane reduction
        out_ref[r:r + 1, :] += jnp.sum(v, axis=1)


# ----------------------------------------------------------------------------
# Wrappers
# ----------------------------------------------------------------------------
def _plane_view(x, pad_value):
    """(B, C, H, W) -> ((B*C, hw_rows, LANE), hw_rows) lane-dense pixel planes.

    Free (no-copy) reshape when H*W % 128 == 0; otherwise only the pixel axis
    is padded (NaN for ground truth => padded pixels are auto-masked).
    Original dtype is preserved (bf16 inputs keep half the DMA bytes).
    """
    x = jnp.asarray(x)
    b, c, h, w = x.shape
    hw = h * w
    flat = x.reshape(b * c, hw)
    rem = hw % LANE
    if rem:
        flat = jnp.pad(flat, ((0, 0), (0, LANE - rem)),
                       constant_values=pad_value)
    hw_rows = flat.shape[1] // LANE
    return flat.reshape(b * c, hw_rows, LANE), hw_rows


def _fused_loss_sums(z_hat, z_gt, n_hat, n_gt, row_block=ROW_BLOCK):
    assert z_hat.ndim == 4 and n_hat.shape[1] == 3 and n_gt.shape[1] == 3
    zh, hw_rows = _plane_view(z_hat, 0.0)
    zg, _ = _plane_view(z_gt, jnp.nan)
    nh, _ = _plane_view(n_hat, 0.0)
    ng, _ = _plane_view(n_gt, jnp.nan)
    batch = z_hat.shape[0]

    rb = min(row_block, hw_rows)          # block == full dim if image is small
    nblocks = -(-hw_rows // rb)           # pixel-row blocks per image
    half = -(-nblocks // 2)               # blocks handled by each TC half

    def blk(i, j):                        # clamp duplicated tail block
        return jnp.minimum(i * half + j, nblocks - 1)

    z_spec = pl.BlockSpec((1, rb, LANE), lambda i, b, j: (b, blk(i, j), 0))

    def n_spec(c):
        def imap(i, b, j):
            return (b * 3 + c, blk(i, j), 0)
        return pl.BlockSpec((1, rb, LANE), imap)

    kernel = functools.partial(_loss_kernel, hw_rows=hw_rows,
                               row_block=rb, half_blocks=half)

    acc = pl.pallas_call(
        kernel,
        out_shape=jax.ShapeDtypeStruct((2 * SUB, LANE), jnp.float32),
        grid_spec=pltpu.PrefetchScalarGridSpec(
            num_scalar_prefetch=0,
            grid=(2, batch, half),
            in_specs=[z_spec, z_spec,
                      n_spec(0), n_spec(1), n_spec(2),
                      n_spec(0), n_spec(1), n_spec(2)],
            out_specs=pl.BlockSpec((SUB, LANE), lambda i, b, j: (i, 0)),
        ),
        compiler_params=pltpu.CompilerParams(
            dimension_semantics=("parallel", "arbitrary", "arbitrary")),
    )(zh, zg, nh, nh, nh, ng, ng, ng)     # same buffers reused, 3 channel views

    return jnp.sum(acc.reshape(2, SUB, LANE), axis=(0, 2))   # (8,) global sums


def geonet_losses(z_hat, z_gt, n_hat, n_gt, depth_scale=1.0, normal_scale=1.0):
    s = _fused_loss_sums(z_hat, z_gt, n_hat, n_gt)
    cnt_d, sa, sb, saa, sbb, sab, cnt_n, sum_1m_cos = (
        s[0], s[1], s[2], s[3], s[4], s[5], s[6], s[7])
    ma = sa / cnt_d
    mb = sb / cnt_d
    # One-pass expanded MSE of (zh/mean(zh) - zg/mean(zg)).  The f32 combine
    # can lose relative precision when the normalized fields nearly coincide
    # (loss -> 0), but absolute error stays tiny; kept one-pass to avoid a
    # second full HBM read.
    mse = (saa / (ma * ma) - 2.0 * sab / (ma * mb) + sbb / (mb * mb)) / cnt_d
    depth_loss = mse * depth_scale
    normal_loss = (sum_1m_cos / cnt_n) * normal_scale
    return depth_loss, normal_loss


class LossPallas:
    """Pallas port of depthsense.util.loss.Loss (forward pass)."""

    def __init__(self, depth_scale: float = 1.0, normal_scale: float = 1.0):
        self.ds = float(depth_scale)
        self.ns = float(normal_scale)
        # Parameters exist in the PyTorch module but are NOT used in forward();
        # kept (zero-init) for parity.
        self.log_sigma_d = jnp.zeros((), jnp.float32)
        self.log_sigma_n = jnp.zeros((), jnp.float32)
        self._fn = jax.jit(functools.partial(
            geonet_losses, depth_scale=self.ds, normal_scale=self.ns))

    def __call__(self, z_hat, z_gt, n_hat, n_gt):
        return self._fn(z_hat, z_gt, n_hat, n_gt)


# ----------------------------------------------------------------------------
# Reference (numpy, mirrors the PyTorch semantics) and demo
# ----------------------------------------------------------------------------
def _ref_loss(zh, zg, nh, ng, ds, ns):
    zh = np.asarray(zh, np.float32)
    zg = np.asarray(zg, np.float32)
    nh = np.asarray(nh, np.float32)
    ng = np.asarray(ng, np.float32)

    zmask = ~np.isnan(zg)
    a = zh[zmask]
    b = zg[zmask]
    a = a / a.mean()
    b = b / b.mean()
    dl = np.mean((a - b) ** 2) * ds

    nh_flat = np.transpose(nh, (0, 2, 3, 1)).reshape(-1, 3)
    ng_flat = np.transpose(ng, (0, 2, 3, 1)).reshape(-1, 3)
    nmask = ~np.isnan(ng_flat).any(axis=1)
    h = nh_flat[nmask]
    g = ng_flat[nmask]
    dot = (h * g).sum(axis=1)
    denom = np.maximum(
        np.linalg.norm(h, axis=1) * np.linalg.norm(g, axis=1), _EPS)
    cos = dot / denom
    nl = np.mean(1.0 - cos) * ns
    return dl, nl


if __name__ == "__main__":
    B, H, W = 2, 16, 16
    key = jax.random.PRNGKey(0)
    k1, k2, k3, k4, k5, k6 = jax.random.split(key, 6)

    z_hat = jax.random.uniform(k1, (B, 1, H, W), jnp.float32, 0.5, 2.5)
    z_gt = jax.random.uniform(k2, (B, 1, H, W), jnp.float32, 0.5, 2.5)
    z_gt = jnp.where(jax.random.uniform(k3, (B, 1, H, W)) < 0.2, jnp.nan, z_gt)

    n_hat = jax.random.normal(k4, (B, 3, H, W), jnp.float32)
    n_gt = jax.random.normal(k5, (B, 3, H, W), jnp.float32)
    pix_nan = jax.random.uniform(k6, (B, 1, H, W)) < 0.15
    n_gt = jnp.where(jnp.broadcast_to(pix_nan, n_gt.shape), jnp.nan, n_gt)

    loss_mod = LossPallas(depth_scale=1.0, normal_scale=1.0)
    dl, nl = loss_mod(z_hat, z_gt, n_hat, n_gt)
    jax.block_until_ready((dl, nl))

    ref_dl, ref_nl = _ref_loss(z_hat, z_gt, n_hat, n_gt, 1.0, 1.0)
    np.testing.assert_allclose(np.asarray(dl), ref_dl, rtol=1e-4, atol=1e-5)
    np.testing.assert_allclose(np.asarray(nl), ref_nl, rtol=1e-4, atol=1e-5)

    print("KERNEL_OK")
</pallas_src>

<mosaic_0001>
module attributes {stable_mosaic.version = 11 : i64} {
  func.func @_loss_kernel(%arg0: i32, %arg1: i32, %arg2: i32, %arg3: memref<1x2x128xf32, #tpu.memory_space<vmem>>, %arg4: memref<1x2x128xf32, #tpu.memory_space<vmem>>, %arg5: memref<1x2x128xf32, #tpu.memory_space<vmem>>, %arg6: memref<1x2x128xf32, #tpu.memory_space<vmem>>, %arg7: memref<1x2x128xf32, #tpu.memory_space<vmem>>, %arg8: memref<1x2x128xf32, #tpu.memory_space<vmem>>, %arg9: memref<1x2x128xf32, #tpu.memory_space<vmem>>, %arg10: memref<1x2x128xf32, #tpu.memory_space<vmem>>, %arg11: memref<8x128xf32, #tpu.memory_space<vmem>>) attributes {dimension_semantics = [#tpu.dimension_semantics<parallel>, #tpu.dimension_semantics<arbitrary>, #tpu.dimension_semantics<arbitrary>], iteration_bounds = array<i64: 2, 2, 1>, scalar_prefetch = 0 : i64, scratch_operands = 0 : i64, tpu.core_type = #tpu.core_type<tc>, window_params = [{transform_indices = @transform_0, window_bounds = array<i64: 1, 2, 128>}, {transform_indices = @transform_1, window_bounds = array<i64: 1, 2, 128>}, {transform_indices = @transform_2, window_bounds = array<i64: 1, 2, 128>}, {transform_indices = @transform_3, window_bounds = array<i64: 1, 2, 128>}, {transform_indices = @transform_4, window_bounds = array<i64: 1, 2, 128>}, {transform_indices = @transform_5, window_bounds = array<i64: 1, 2, 128>}, {transform_indices = @transform_6, window_bounds = array<i64: 1, 2, 128>}, {transform_indices = @transform_7, window_bounds = array<i64: 1, 2, 128>}, {transform_indices = @transform_8, window_bounds = array<i64: 8, 128>}]} {
    %c0_i32 = arith.constant 0 : i32
    %0 = arith.cmpi eq, %arg1, %c0_i32 : i32
    %c0_i32_0 = arith.constant 0 : i32
    %1 = arith.cmpi eq, %arg2, %c0_i32_0 : i32
    %2 = arith.andi %0, %1 : i1
    %3 = arith.extui %2 : i1 to i32
    %c0_i32_1 = arith.constant 0 : i32
    %4 = arith.cmpi ne, %3, %c0_i32_1 : i32
    scf.if %4 {
      %cst_71 = arith.constant 0.000000e+00 : f32
      %110 = vector.broadcast %cst_71 : f32 to vector<8x128xf32>
      %c0_72 = arith.constant 0 : index
      %c0_73 = arith.constant 0 : index
      %111 = vector.load %arg11[%c0_72, %c0_73] : memref<8x128xf32, #tpu.memory_space<vmem>>, vector<8x128xf32>
      tpu.vector_store %arg11[%c0_72, %c0_73], %110 {strides = array<i32>} : memref<8x128xf32, #tpu.memory_space<vmem>>, vector<8x128xf32>,
    } else {
    }
    %c1_i32 = arith.constant 1 : i32
    %5 = arith.muli %arg0, %c1_i32 : i32
    %6 = arith.addi %5, %arg2 : i32
    %7 = tpu.iota {dimensions = array<i32: 1>} : vector<1x2x128xi32>
    %c2_i32 = arith.constant 2 : i32
    %8 = arith.muli %6, %c2_i32 : i32
    %9 = vector.broadcast %8 : i32 to vector<1x2x128xi32>
    %10 = arith.addi %9, %7 : vector<1x2x128xi32>
    %c2_i32_2 = arith.constant 2 : i32
    %11 = vector.broadcast %c2_i32_2 : i32 to vector<1x2x128xi32>
    %12 = arith.cmpi slt, %10, %11 : vector<1x2x128xi32>
    %c0 = arith.constant 0 : index
    %c0_3 = arith.constant 0 : index
    %c0_4 = arith.constant 0 : index
    %13 = vector.load %arg3[%c0, %c0_3, %c0_4] : memref<1x2x128xf32, #tpu.memory_space<vmem>>, vector<1x2x128xf32>
    %c0_5 = arith.constant 0 : index
    %c0_6 = arith.constant 0 : index
    %c0_7 = arith.constant 0 : index
    %14 = vector.load %arg4[%c0_5, %c0_6, %c0_7] : memref<1x2x128xf32, #tpu.memory_space<vmem>>, vector<1x2x128xf32>
    %15 = arith.cmpf one, %14, %14 : vector<1x2x128xf32>
    %cst = arith.constant dense<true> : vector<1x2x128xi1>
    %16 = arith.xori %15, %cst : vector<1x2x128xi1>
    %17 = arith.andi %12, %16 : vector<1x2x128xi1>
    %18 = arith.extui %17 : vector<1x2x128xi1> to vector<1x2x128xi32>
    %19 = arith.sitofp %18 : vector<1x2x128xi32> to vector<1x2x128xf32>
    %cst_8 = arith.constant 0.000000e+00 : f32
    %20 = vector.broadcast %cst_8 : f32 to vector<1x2x128xf32>
    %21 = arith.select %17, %13, %20 : vector<1x2x128xi1>, vector<1x2x128xf32>
    %cst_9 = arith.constant 0.000000e+00 : f32
    %22 = vector.broadcast %cst_9 : f32 to vector<1x2x128xf32>
    %23 = arith.select %17, %14, %22 : vector<1x2x128xi1>, vector<1x2x128xf32>
    %c0_10 = arith.constant 0 : index
    %c0_11 = arith.constant 0 : index
    %c0_12 = arith.constant 0 : index
    %24 = vector.load %arg5[%c0_10, %c0_11, %c0_12] : memref<1x2x128xf32, #tpu.memory_space<vmem>>, vector<1x2x128xf32>
    %c0_13 = arith.constant 0 : index
    %c0_14 = arith.constant 0 : index
    %c0_15 = arith.constant 0 : index
    %25 = vector.load %arg6[%c0_13, %c0_14, %c0_15] : memref<1x2x128xf32, #tpu.memory_space<vmem>>, vector<1x2x128xf32>
    %c0_16 = arith.constant 0 : index
    %c0_17 = arith.constant 0 : index
    %c0_18 = arith.constant 0 : index
    %26 = vector.load %arg7[%c0_16, %c0_17, %c0_18] : memref<1x2x128xf32, #tpu.memory_space<vmem>>, vector<1x2x128xf32>
    %c0_19 = arith.constant 0 : index
    %c0_20 = arith.constant 0 : index
    %c0_21 = arith.constant 0 : index
    %27 = vector.load %arg8[%c0_19, %c0_20, %c0_21] : memref<1x2x128xf32, #tpu.memory_space<vmem>>, vector<1x2x128xf32>
    %c0_22 = arith.constant 0 : index
    %c0_23 = arith.constant 0 : index
    %c0_24 = arith.constant 0 : index
    %28 = vector.load %arg9[%c0_22, %c0_23, %c0_24] : memref<1x2x128xf32, #tpu.memory_space<vmem>>, vector<1x2x128xf32>
    %c0_25 = arith.constant 0 : index
    %c0_26 = arith.constant 0 : index
    %c0_27 = arith.constant 0 : index
    %29 = vector.load %arg10[%c0_25, %c0_26, %c0_27] : memref<1x2x128xf32, #tpu.memory_space<vmem>>, vector<1x2x128xf32>
    %30 = arith.cmpf one, %27, %27 : vector<1x2x128xf32>
    %31 = arith.cmpf one, %28, %28 : vector<1x2x128xf32>
    %32 = arith.ori %30, %31 : vector<1x2x128xi1>
    %33 = arith.cmpf one, %29, %29 : vector<1x2x128xf32>
    %34 = arith.ori %32, %33 : vector<1x2x128xi1>
    %cst_28 = arith.constant dense<true> : vector<1x2x128xi1>
    %35 = arith.xori %34, %cst_28 : vector<1x2x128xi1>
    %36 = arith.andi %12, %35 : vector<1x2x128xi1>
    %37 = arith.extui %36 : vector<1x2x128xi1> to vector<1x2x128xi32>
    %38 = arith.sitofp %37 : vector<1x2x128xi32> to vector<1x2x128xf32>
    %cst_29 = arith.constant 0.000000e+00 : f32
    %39 = vector.broadcast %cst_29 : f32 to vector<1x2x128xf32>
    %40 = arith.select %36, %24, %39 : vector<1x2x128xi1>, vector<1x2x128xf32>
    %cst_30 = arith.constant 0.000000e+00 : f32
    %41 = vector.broadcast %cst_30 : f32 to vector<1x2x128xf32>
    %42 = arith.select %36, %25, %41 : vector<1x2x128xi1>, vector<1x2x128xf32>
    %cst_31 = arith.constant 0.000000e+00 : f32
    %43 = vector.broadcast %cst_31 : f32 to vector<1x2x128xf32>
    %44 = arith.select %36, %26, %43 : vector<1x2x128xi1>, vector<1x2x128xf32>
    %cst_32 = arith.constant 0.000000e+00 : f32
    %45 = vector.broadcast %cst_32 : f32 to vector<1x2x128xf32>
    %46 = arith.select %36, %27, %45 : vector<1x2x128xi1>, vector<1x2x128xf32>
    %cst_33 = arith.constant 0.000000e+00 : f32
    %47 = vector.broadcast %cst_33 : f32 to vector<1x2x128xf32>
    %48 = arith.select %36, %28, %47 : vector<1x2x128xi1>, vector<1x2x128xf32>
    %cst_34 = arith.constant 0.000000e+00 : f32
    %49 = vector.broadcast %cst_34 : f32 to vector<1x2x128xf32>
    %50 = arith.select %36, %29, %49 : vector<1x2x128xi1>, vector<1x2x128xf32>
    %51 = arith.mulf %40, %46 : vector<1x2x128xf32>
    %52 = arith.mulf %42, %48 : vector<1x2x128xf32>
    %53 = arith.addf %51, %52 : vector<1x2x128xf32>
    %54 = arith.mulf %44, %50 : vector<1x2x128xf32>
    %55 = arith.addf %53, %54 : vector<1x2x128xf32>
    %56 = arith.mulf %40, %40 : vector<1x2x128xf32>
    %57 = arith.mulf %42, %42 : vector<1x2x128xf32>
    %58 = arith.addf %56, %57 : vector<1x2x128xf32>
    %59 = arith.mulf %44, %44 : vector<1x2x128xf32>
    %60 = arith.addf %58, %59 : vector<1x2x128xf32>
    %61 = arith.mulf %46, %46 : vector<1x2x128xf32>
    %62 = arith.mulf %48, %48 : vector<1x2x128xf32>
    %63 = arith.addf %61, %62 : vector<1x2x128xf32>
    %64 = arith.mulf %50, %50 : vector<1x2x128xf32>
    %65 = arith.addf %63, %64 : vector<1x2x128xf32>
    %66 = arith.mulf %60, %65 : vector<1x2x128xf32>
    %cst_35 = arith.constant 1.000000e-16 : f32
    %67 = vector.broadcast %cst_35 : f32 to vector<1x2x128xf32>
    %68 = arith.maximumf %66, %67 : vector<1x2x128xf32>
    %69 = math.rsqrt %68 : vector<1x2x128xf32>
    %70 = arith.mulf %55, %69 : vector<1x2x128xf32>
    %cst_36 = arith.constant 1.000000e+00 : f32
    %71 = vector.broadcast %cst_36 : f32 to vector<1x2x128xf32>
    %72 = arith.subf %71, %70 : vector<1x2x128xf32>
    %cst_37 = arith.constant 0.000000e+00 : f32
    %73 = vector.broadcast %cst_37 : f32 to vector<1x2x128xf32>
    %74 = arith.select %36, %72, %73 : vector<1x2x128xi1>, vector<1x2x128xf32>
    %75 = arith.mulf %21, %21 : vector<1x2x128xf32>
    %76 = arith.mulf %23, %23 : vector<1x2x128xf32>
    %77 = arith.mulf %21, %23 : vector<1x2x128xf32>
    %c0_38 = arith.constant 0 : index
    %c0_39 = arith.constant 0 : index
    %78 = vector.load %arg11[%c0_38, %c0_39] : memref<8x128xf32, #tpu.memory_space<vmem>>, vector<1x128xf32>
    %cst_40 = arith.constant dense<0.000000e+00> : vector<1x128xf32>
    %79 = vector.multi_reduction <add>, %19, %cst_40 [1] : vector<1x2x128xf32> to vector<1x128xf32>
    %80 = arith.addf %78, %79 : vector<1x128xf32>
    %c0_41 = arith.constant 0 : index
    %c0_42 = arith.constant 0 : index
    %81 = vector.load %arg11[%c0_41, %c0_42] : memref<8x128xf32, #tpu.memory_space<vmem>>, vector<1x128xf32>
    tpu.vector_store %arg11[%c0_41, %c0_42], %80 {strides = array<i32>} : memref<8x128xf32, #tpu.memory_space<vmem>>, vector<1x128xf32>,
    %c1 = arith.constant 1 : index
    %c0_43 = arith.constant 0 : index
    %82 = vector.load %arg11[%c1, %c0_43] : memref<8x128xf32, #tpu.memory_space<vmem>>, vector<1x128xf32>
    %cst_44 = arith.constant dense<0.000000e+00> : vector<1x128xf32>
    %83 = vector.multi_reduction <add>, %21, %cst_44 [1] : vector<1x2x128xf32> to vector<1x128xf32>
    %84 = arith.addf %82, %83 : vector<1x128xf32>
    %c1_45 = arith.constant 1 : index
    %c0_46 = arith.constant 0 : index
    %85 = vector.load %arg11[%c1_45, %c0_46] : memref<8x128xf32, #tpu.memory_space<vmem>>, vector<1x128xf32>
    tpu.vector_store %arg11[%c1_45, %c0_46], %84 {strides = array<i32>} : memref<8x128xf32, #tpu.memory_space<vmem>>, vector<1x128xf32>,
    %c2 = arith.constant 2 : index
    %c0_47 = arith.constant 0 : index
    %86 = vector.load %arg11[%c2, %c0_47] : memref<8x128xf32, #tpu.memory_space<vmem>>, vector<1x128xf32>
    %cst_48 = arith.constant dense<0.000000e+00> : vector<1x128xf32>
    %87 = vector.multi_reduction <add>, %23, %cst_48 [1] : vector<1x2x128xf32> to vector<1x128xf32>
    %88 = arith.addf %86, %87 : vector<1x128xf32>
    %c2_49 = arith.constant 2 : index
    %c0_50 = arith.constant 0 : index
    %89 = vector.load %arg11[%c2_49, %c0_50] : memref<8x128xf32, #tpu.memory_space<vmem>>, vector<1x128xf32>
    tpu.vector_store %arg11[%c2_49, %c0_50], %88 {strides = array<i32>} : memref<8x128xf32, #tpu.memory_space<vmem>>, vector<1x128xf32>,
    %c3 = arith.constant 3 : index
    %c0_51 = arith.constant 0 : index
    %90 = vector.load %arg11[%c3, %c0_51] : memref<8x128xf32, #tpu.memory_space<vmem>>, vector<1x128xf32>
    %cst_52 = arith.constant dense<0.000000e+00> : vector<1x128xf32>
    %91 = vector.multi_reduction <add>, %75, %cst_52 [1] : vector<1x2x128xf32> to vector<1x128xf32>
    %92 = arith.addf %90, %91 : vector<1x128xf32>
    %c3_53 = arith.constant 3 : index
    %c0_54 = arith.constant 0 : index
    %93 = vector.load %arg11[%c3_53, %c0_54] : memref<8x128xf32, #tpu.memory_space<vmem>>, vector<1x128xf32>
    tpu.vector_store %arg11[%c3_53, %c0_54], %92 {strides = array<i32>} : memref<8x128xf32, #tpu.memory_space<vmem>>, vector<1x128xf32>,
    %c4 = arith.constant 4 : index
    %c0_55 = arith.constant 0 : index
    %94 = vector.load %arg11[%c4, %c0_55] : memref<8x128xf32, #tpu.memory_space<vmem>>, vector<1x128xf32>
    %cst_56 = arith.constant dense<0.000000e+00> : vector<1x128xf32>
    %95 = vector.multi_reduction <add>, %76, %cst_56 [1] : vector<1x2x128xf32> to vector<1x128xf32>
    %96 = arith.addf %94, %95 : vector<1x128xf32>
    %c4_57 = arith.constant 4 : index
    %c0_58 = arith.constant 0 : index
    %97 = vector.load %arg11[%c4_57, %c0_58] : memref<8x128xf32, #tpu.memory_space<vmem>>, vector<1x128xf32>
    tpu.vector_store %arg11[%c4_57, %c0_58], %96 {strides = array<i32>} : memref<8x128xf32, #tpu.memory_space<vmem>>, vector<1x128xf32>,
    %c5 = arith.constant 5 : index
    %c0_59 = arith.constant 0 : index
    %98 = vector.load %arg11[%c5, %c0_59] : memref<8x128xf32, #tpu.memory_space<vmem>>, vector<1x128xf32>
    %cst_60 = arith.constant dense<0.000000e+00> : vector<1x128xf32>
    %99 = vector.multi_reduction <add>, %77, %cst_60 [1] : vector<1x2x128xf32> to vector<1x128xf32>
    %100 = arith.addf %98, %99 : vector<1x128xf32>
    %c5_61 = arith.constant 5 : index
    %c0_62 = arith.constant 0 : index
    %101 = vector.load %arg11[%c5_61, %c0_62] : memref<8x128xf32, #tpu.memory_space<vmem>>, vector<1x128xf32>
    tpu.vector_store %arg11[%c5_61, %c0_62], %100 {strides = array<i32>} : memref<8x128xf32, #tpu.memory_space<vmem>>, vector<1x128xf32>,
    %c6 = arith.constant 6 : index
    %c0_63 = arith.constant 0 : index
    %102 = vector.load %arg11[%c6, %c0_63] : memref<8x128xf32, #tpu.memory_space<vmem>>, vector<1x128xf32>
    %cst_64 = arith.constant dense<0.000000e+00> : vector<1x128xf32>
    %103 = vector.multi_reduction <add>, %38, %cst_64 [1] : vector<1x2x128xf32> to vector<1x128xf32>
    %104 = arith.addf %102, %103 : vector<1x128xf32>
    %c6_65 = arith.constant 6 : index
    %c0_66 = arith.constant 0 : index
    %105 = vector.load %arg11[%c6_65, %c0_66] : memref<8x128xf32, #tpu.memory_space<vmem>>, vector<1x128xf32>
    tpu.vector_store %arg11[%c6_65, %c0_66], %104 {strides = array<i32>} : memref<8x128xf32, #tpu.memory_space<vmem>>, vector<1x128xf32>,
    %c7 = arith.constant 7 : index
    %c0_67 = arith.constant 0 : index
    %106 = vector.load %arg11[%c7, %c0_67] : memref<8x128xf32, #tpu.memory_space<vmem>>, vector<1x128xf32>
    %cst_68 = arith.constant dense<0.000000e+00> : vector<1x128xf32>
    %107 = vector.multi_reduction <add>, %74, %cst_68 [1] : vector<1x2x128xf32> to vector<1x128xf32>
    %108 = arith.addf %106, %107 : vector<1x128xf32>
    %c7_69 = arith.constant 7 : index
    %c0_70 = arith.constant 0 : index
    %109 = vector.load %arg11[%c7_69, %c0_70] : memref<8x128xf32, #tpu.memory_space<vmem>>, vector<1x128xf32>
    tpu.vector_store %arg11[%c7_69, %c0_70], %108 {strides = array<i32>} : memref<8x128xf32, #tpu.memory_space<vmem>>, vector<1x128xf32>,
    return
  }
  func.func @transform_0(%arg0: i32, %arg1: i32, %arg2: i32) -> (i32, i32, i32) {
    %c1_i32 = arith.constant 1 : i32
    %0 = arith.muli %arg0, %c1_i32 : i32
    %1 = arith.addi %0, %arg2 : i32
    %c0_i32 = arith.constant 0 : i32
    %2 = arith.minsi %1, %c0_i32 : i32
    %c0_i32_0 = arith.constant 0 : i32
    %c0_i32_1 = arith.constant 0 : i32
    return %arg1, %2, %c0_i32_0 : i32, i32, i32
  }
  func.func @transform_1(%arg0: i32, %arg1: i32, %arg2: i32) -> (i32, i32, i32) {
    %c1_i32 = arith.constant 1 : i32
    %0 = arith.muli %arg0, %c1_i32 : i32
    %1 = arith.addi %0, %arg2 : i32
    %c0_i32 = arith.constant 0 : i32
    %2 = arith.minsi %1, %c0_i32 : i32
    %c0_i32_0 = arith.constant 0 : i32
    %c0_i32_1 = arith.constant 0 : i32
    return %arg1, %2, %c0_i32_0 : i32, i32, i32
  }
  func.func @transform_2(%arg0: i32, %arg1: i32, %arg2: i32) -> (i32, i32, i32) {
    %c3_i32 = arith.constant 3 : i32
    %0 = arith.muli %arg1, %c3_i32 : i32
    %c0_i32 = arith.constant 0 : i32
    %1 = arith.addi %0, %c0_i32 : i32
    %c1_i32 = arith.constant 1 : i32
    %2 = arith.muli %arg0, %c1_i32 : i32
    %3 = arith.addi %2, %arg2 : i32
    %c0_i32_0 = arith.constant 0 : i32
    %4 = arith.minsi %3, %c0_i32_0 : i32
    %c0_i32_1 = arith.constant 0 : i32
    %c0_i32_2 = arith.constant 0 : i32
    return %1, %4, %c0_i32_1 : i32, i32, i32
  }
  func.func @transform_3(%arg0: i32, %arg1: i32, %arg2: i32) -> (i32, i32, i32) {
    %c3_i32 = arith.constant 3 : i32
    %0 = arith.muli %arg1, %c3_i32 : i32
    %c1_i32 = arith.constant 1 : i32
    %1 = arith.addi %0, %c1_i32 : i32
    %c1_i32_0 = arith.constant 1 : i32
    %2 = arith.muli %arg0, %c1_i32_0 : i32
    %3 = arith.addi %2, %arg2 : i32
    %c0_i32 = arith.constant 0 : i32
    %4 = arith.minsi %3, %c0_i32 : i32
    %c0_i32_1 = arith.constant 0 : i32
    %c0_i32_2 = arith.constant 0 : i32
    return %1, %4, %c0_i32_1 : i32, i32, i32
  }
  func.func @transform_4(%arg0: i32, %arg1: i32, %arg2: i32) -> (i32, i32, i32) {
    %c3_i32 = arith.constant 3 : i32
    %0 = arith.muli %arg1, %c3_i32 : i32
    %c2_i32 = arith.constant 2 : i32
    %1 = arith.addi %0, %c2_i32 : i32
    %c1_i32 = arith.constant 1 : i32
    %2 = arith.muli %arg0, %c1_i32 : i32
    %3 = arith.addi %2, %arg2 : i32
    %c0_i32 = arith.constant 0 : i32
    %4 = arith.minsi %3, %c0_i32 : i32
    %c0_i32_0 = arith.constant 0 : i32
    %c0_i32_1 = arith.constant 0 : i32
    return %1, %4, %c0_i32_0 : i32, i32, i32
  }
  func.func @transform_5(%arg0: i32, %arg1: i32, %arg2: i32) -> (i32, i32, i32) {
    %c3_i32 = arith.constant 3 : i32
    %0 = arith.muli %arg1, %c3_i32 : i32
    %c0_i32 = arith.constant 0 : i32
    %1 = arith.addi %0, %c0_i32 : i32
    %c1_i32 = arith.constant 1 : i32
    %2 = arith.muli %arg0, %c1_i32 : i32
    %3 = arith.addi %2, %arg2 : i32
    %c0_i32_0 = arith.constant 0 : i32
    %4 = arith.minsi %3, %c0_i32_0 : i32
    %c0_i32_1 = arith.constant 0 : i32
    %c0_i32_2 = arith.constant 0 : i32
    return %1, %4, %c0_i32_1 : i32, i32, i32
  }
  func.func @transform_6(%arg0: i32, %arg1: i32, %arg2: i32) -> (i32, i32, i32) {
    %c3_i32 = arith.constant 3 : i32
    %0 = arith.muli %arg1, %c3_i32 : i32
    %c1_i32 = arith.constant 1 : i32
    %1 = arith.addi %0, %c1_i32 : i32
    %c1_i32_0 = arith.constant 1 : i32
    %2 = arith.muli %arg0, %c1_i32_0 : i32
    %3 = arith.addi %2, %arg2 : i32
    %c0_i32 = arith.constant 0 : i32
    %4 = arith.minsi %3, %c0_i32 : i32
    %c0_i32_1 = arith.constant 0 : i32
    %c0_i32_2 = arith.constant 0 : i32
    return %1, %4, %c0_i32_1 : i32, i32, i32
  }
  func.func @transform_7(%arg0: i32, %arg1: i32, %arg2: i32) -> (i32, i32, i32) {
    %c3_i32 = arith.constant 3 : i32
    %0 = arith.muli %arg1, %c3_i32 : i32
    %c2_i32 = arith.constant 2 : i32
    %1 = arith.addi %0, %c2_i32 : i32
    %c1_i32 = arith.constant 1 : i32
    %2 = arith.muli %arg0, %c1_i32 : i32
    %3 = arith.addi %2, %arg2 : i32
    %c0_i32 = arith.constant 0 : i32
    %4 = arith.minsi %3, %c0_i32 : i32
    %c0_i32_0 = arith.constant 0 : i32
    %c0_i32_1 = arith.constant 0 : i32
    return %1, %4, %c0_i32_0 : i32, i32, i32
  }
  func.func @transform_8(%arg0: i32, %arg1: i32, %arg2: i32) -> (i32, i32) {
    %c0_i32 = arith.constant 0 : i32
    %c0_i32_0 = arith.constant 0 : i32
    return %arg0, %c0_i32 : i32, i32
  }
}

</mosaic_0001>

<bundles_post_ra>
// kernel: geonet_losses.1
= control target key start
LH: loop header
LB: loop body
LE: loop exit
PB: predicated region body
PF: predicated region fallthrough
CT: control target
= control target key end

     0   :  { %s1267_s27 = smov 0   ;;  %s1269_s28 = smov 0   ;;  %s1457_s0 = inlined_call_operand.vmem [shape: f32[2,2,128], index: 0, kind: input, shape index: {}]   ;;  %s1458_s1 = inlined_call_operand.vmem [shape: f32[2,2,128], index: 1, kind: input, shape index: {}]   ;;  %s1459_s2 = inlined_call_operand.vmem [shape: f32[6,2,128], index: 2, kind: input, shape index: {}, may-alias: {2,3,4}]   ;;  %s1460_s3 = inlined_call_operand.vmem [shape: f32[6,2,128], index: 3, kind: input, shape index: {}, may-alias: {2,3,4}]   ;;  %s1461_s4 = inlined_call_operand.vmem [shape: f32[6,2,128], index: 4, kind: input, shape index: {}, may-alias: {2,3,4}]   ;;  %s1462_s5 = inlined_call_operand.vmem [shape: f32[6,2,128], index: 5, kind: input, shape index: {}, may-alias: {5,6,7}]   ;;  %s1463_s6 = inlined_call_operand.vmem [shape: f32[6,2,128], index: 6, kind: input, shape index: {}, may-alias: {5,6,7}]   ;;  %s1464_s7 = inlined_call_operand.vmem [shape: f32[6,2,128], index: 7, kind: input, shape index: {}, may-alias: {5,6,7}]   ;;  %s1465_s8 = inlined_call_operand.vmem [shape: f32[16,128], index: 8, kind: output, shape index: {}]  }
   0x1   :  { %1468 = sst [smem:[#allocation6_spill]] %s1458_s1  ;;  %s1271_s29 = smov 0  }
   0x2   :  { %1469 = sst [smem:[#allocation7_spill]] %s1462_s5  ;;  %s1273_s30 = smov 0  }
   0x3   :  { %s1275_s9 = smov 0  }
   0x4 LB: > { %1470 = sst [smem:[#allocation2_spill]] %s1209_s29  ;;  %s33_s10 = sadd.s32 1, %s1209_s29  ;;  %s1217_s9 = sphi %s1275_s9, %s18_s9   ;;  %s1213_s30 = sphi %s1273_s30, %s1484_s30   ;;  %s1209_s29 = sphi %s1271_s29, %s1483_s29   ;;  %s1205_s28 = sphi %s1269_s28, %s1482_s28   ;;  %s1201_s27 = sphi %s1267_s27, %s1481_s27  }
   0x5   : > { %1471 = sst [smem:[#allocation3_spill]] %s1213_s30  ;;  %s37_s11 = sadd.s32 1, %s1213_s30 }
   0x6   : > { %p35_p0 = scmp.ge.s32.totalorder %s33_s10, 2  ;;  %p1093_p1 = scmp.ge.s32.totalorder %s1217_s9, 1 }
   0x7   : > { %p519_p2 = scmp.lt.s32.totalorder %s1217_s9, 5 }
   0x8   : > { %s1486_s10 = smov (%p35_p0, %s33_s10), 0  ;;  %s1488_s11 = smov (!%p35_p0, %s37_s11), %s1213_s30 }
   0x9   : > { %1472 = sst [smem:[#allocation4_spill]] %s1486_s10  ;;  %p520_p3 = pnand %p1093_p1, %p519_p2 }
   0xa   : > { %p39_p4 = scmp.ge.s32.totalorder %s1488_s11, 2  ;;  %p638_p5 = scmp.lt.s32.totalorder (!%p520_p3), %s1205_s28, 0 }
   0xb   : > { %523 = sbr.rel (%p520_p3) target bundleno = 102 (0x66), region = 52  ;;  %p640_p6 = scmp.lt.s32.totalorder (!%p520_p3), %s1201_s27, 1 }
   0xc   : > { %s1490_s11 = smov (%p39_p4, %s1488_s11), 0  ;;  %s663_s12 = smul.u32 (!%p520_p3), 3, %s1201_s27 }
   0xd   : > { %1473 = sst [smem:[#allocation5_spill]] %s1490_s11  ;;  %p761_p7 = scmp.lt.s32.totalorder (!%p520_p3), %s1205_s28, 1 }
   0xe   : > { %p667_p8 = scmp.lt.s32.totalorder (!%p520_p3), %s663_s12, 5  ;;  %s679_s15 = sadd.s32 (!%p520_p3), 1, %s663_s12 }
   0xf   : > { %p683_p9 = scmp.lt.s32.totalorder (!%p520_p3), %s679_s15, 5  ;;  %s696_s18 = sadd.s32 (!%p520_p3), 2, %s663_s12 }
  0x10   : > { %s1474_s1 = sld [smem:[#allocation6_spill]] (!%p520_p3)  ;;  %p700_p10 = scmp.lt.s32.totalorder (!%p520_p3), %s696_s18, 5 }
  0x11   : > { %s1475_s5 = sld [smem:[#allocation7_spill]] (!%p520_p3)  ;;  %p765_p11 = scmp.eq.s32.totalorder (!%p520_p3), %s1201_s27, 0 }
  0x12   : > { %s639_s13 = scalar_select %p638_p5, %s1205_s28, 0 }
  0x13   : > { %s641_s14 = scalar_select %p640_p6, %s1201_s27, 1 }
  0x14   : > { %s1492_s13 = smov (!%p638_p5, %s639_s13), 0  ;;  %s1494_s12 = smov (!%p667_p8, %s663_s12), 5 }
  0x15   : > { %s644_s16 = sadd.s32 %s1492_s13, %s641_s14  ;;  %s1496_s15 = smov (!%p683_p9, %s679_s15), 5  ;;  %v1219_v0 = vmov (%p765_p11), 0.0  }
  0x16   : > { %s1307_s17 = sshll.u32 %s644_s16, 1  ;;  %s671_s25 = sadd.s32 %s1494_s12, %s1492_s13 }
  0x17   : > { %s659_s24 = scalar_lea.vmem %s1474_s1, %s1307_s17  ;;  %s1317_s26 = sshll.u32 %s671_s25, 1 }
  0x18   : > { %s687_s14 = sadd.s32 %s1496_s15, %s1492_s13  ;;  %s722_s25 = scalar_lea.vmem %s1475_s5, %s1317_s26 }
  0x19   : > { %s1323_s20 = sshll.u32 %s687_s14, 1  ;;  %s1498_s18 = smov (!%p700_p10, %s696_s18), 5 }
  0x1a   : > { %s738_s15 = scalar_lea.vmem %s1463_s6, %s1323_s20  ;;  %s704_s11 = sadd.s32 %s1498_s18, %s1492_s13 }
  0x1b   : > { %s1338_s16 = sshll.u32 %s704_s11, 1  ;;  %770 = sbr.rel (!%p765_p11) target bundleno = 34 (0x22), region = 56 }
  0x1c   : > { %s706_s22 = scalar_lea.vmem %s1461_s4, %s1338_s16  ;;  %s755_s1 = scalar_lea.vmem %s1464_s7, %s1338_s16 }
  0x1d   : > { %s762_s12 = scalar_select %p761_p7, %s1205_s28, 1 }
  0x1f   : > { %s1126_s5 = sshll.u32 %s762_s12, 3 }
  0x20   : > { %s1354_s27 = scalar_lea.vmem %s1465_s8, %s1126_s5 }
  0x21   : > { %771 = vst [vmem:[%s1354_s27] sm:$0xff] (%p765_p11), %v1219_v0 }
  0x22 PF: > { %v773_v1 = vlaneseq  ;;  %s1128_s10 = sshll.u32 %s1205_s28, 1  ;;  %v780_v2 = vld [vmem:[%s659_s24] sm:$0x3]  ;;  %vm1220_vm1 = vmmov 1   ;;  %s1476_s29 = scalar_lea.vmem %s1457_s0, %s1307_s17  ;;  %vm834_vm10 = vcmask 1041408   ;;  %v1221_v10 = vmov 0.0  }
  0x23   : > { %v776_v3 = vstv %s1128_s10  ;;  %vm781_vm0 = vcmp.ne.f32.partialorder %v780_v2, %v780_v2  ;;  %v1358_v4 = vld [vmem:[%s722_s25] sm:$0x3]  ;;  %s1479_s18 = scalar_lea.vmem %s1459_s2, %s1317_s26  ;;  %s1480_s19 = scalar_lea.vmem %s1460_s3, %s1323_s20 }
  0x24   : > { %v1360_v5 = vld [vmem:[%s738_s15] sm:$0x3]  ;;  %v774_v7 = vshrl.u32 %v773_v1, 7  ;;  %vm782_vm2 = vmxor %vm781_vm0, %vm1220_vm1  ;;  %vm794_vm3 = vcmp.ne.f32.partialorder %v1358_v4, %v1358_v4 }
  0x25   : > { %v1362_v6 = vld [vmem:[%s755_s1] sm:$0x3]  ;;  %vm795_vm4 = vcmp.ne.f32.partialorder %v1360_v5, %v1360_v5 }
  0x26   : > { %vm797_vm5 = vcmp.ne.f32.partialorder %v1362_v6, %v1362_v6  ;;  %vm796_vm6 = vmor %vm794_vm3, %vm795_vm4  ;;  %v777_v8 = vadd.s32 %v776_v3, %v774_v7  ;;  %v779_v9 = vld [vmem:[%s1476_s29] sm:$0x3] }
  0x27   : > { %vm798_vm7 = vmor %vm796_vm6, %vm797_vm5  ;;  %v788_v30 = vld [vmem:[%s1479_s18] sm:$0x3] }
  0x28   : > { %vm778_vm8 = vcmp.lt.s32.totalorder %v777_v8, 2  ;;  %vm799_vm9 = vmxor %vm798_vm7, %vm1220_vm1  ;;  %v789_v38 = vld [vmem:[%s1480_s19] sm:$0x3]  ;;  %v854_v58 = vld [vmem:[%s1354_s27 + $0x2] sm:$0x1] }
  0x29   : > { %vm783_vm11 = vmand %vm778_vm8, %vm782_vm2  ;;  %v790_v47 = vld [vmem:[%s706_s22] sm:$0x3]  ;;  %v864_v3 = vld [vmem:[%s1354_s27 + $0x3] sm:$0x1] }
  0x2a   : > { %v1129_v11 = vsel %vm783_vm11, 1.0, %v1221_v10  ;;  %v786_v12 = vsel %vm783_vm11, %v779_v9, 0.0  ;;  %v787_v13 = vsel %vm783_vm11, %v780_v2, 0.0  ;;  %vm1378_vm12 = vmand %vm778_vm8, %vm799_vm9  ;;  %v833_v48 = vld [vmem:[%s1354_s27] sm:$0x1] }
  0x2b   : > { %v835_v14 = vsel %vm834_vm10, %v1129_v11, 0.0  ;;  %v845_v15 = vsel %vm834_vm10, %v786_v12, 0.0  ;;  %v855_v16 = vsel %vm834_vm10, %v787_v13, 0.0  ;;  %v830_v17 = vmul.f32 %v786_v12, %v786_v12  ;;  %v844_v54 = vld [vmem:[%s1354_s27 + $0x1] sm:$0x1] }
  0x2c   : > { %v836_v19 = vrot.slane %v835_v14, 4  ;;  %v846_v20 = vrot.slane %v845_v15, 4  ;;  %v856_v21 = vrot.slane %v855_v16, 4  ;;  %v831_v22 = vmul.f32 %v787_v13, %v787_v13 }
  0x2d   : > { %v865_v23 = vsel %vm834_vm10, %v830_v17, 0.0  ;;  %v832_v24 = vmul.f32 %v787_v13, %v786_v12  ;;  %v1130_v25 = vsel %vm1378_vm12, 1.0, %v1221_v10  ;;  %v1400_v42 = vsel %vm1378_vm12, %v788_v30, 0.0 }
  0x2e   : > { %v837_v26 = vadd.f32 %v836_v19, %v835_v14  ;;  %v847_v27 = vadd.f32 %v846_v20, %v845_v15  ;;  %v857_v28 = vadd.f32 %v856_v21, %v855_v16  ;;  %v866_v29 = vrot.slane %v865_v23, 4  ;;  %v874_v15 = vld [vmem:[%s1354_s27 + $0x4] sm:$0x1] }
  0x2f   : > { %v875_v31 = vsel %vm834_vm10, %v831_v22, 0.0  ;;  %v885_v32 = vsel %vm834_vm10, %v832_v24, 0.0  ;;  %v895_v33 = vsel %vm834_vm10, %v1130_v25, 0.0  ;;  %v804_v52 = vsel %vm1378_vm12, %v789_v38, 0.0  ;;  %v884_v22 = vld [vmem:[%s1354_s27 + $0x5] sm:$0x1] }
  0x30   : > { %v838_v34 = vrot.slane %v837_v26, 2  ;;  %v848_v35 = vrot.slane %v847_v27, 2  ;;  %v858_v36 = vrot.slane %v857_v28, 2  ;;  %v867_v37 = vadd.f32 %v866_v29, %v865_v23  ;;  %v894_v23 = vld [vmem:[%s1354_s27 + $0x6] sm:$0x1] }
  0x31   : > { %v876_v39 = vrot.slane %v875_v31, 4  ;;  %v886_v40 = vrot.slane %v885_v32, 4  ;;  %v896_v41 = vrot.slane %v895_v33, 4  ;;  %v805_v62 = vsel %vm1378_vm12, %v790_v47, 0.0 }
  0x32   : > { %v839_v43 = vadd.f32 %v838_v34, %v837_v26  ;;  %v849_v44 = vadd.f32 %v848_v35, %v847_v27  ;;  %v859_v45 = vadd.f32 %v858_v36, %v857_v28  ;;  %v868_v46 = vrot.slane %v867_v37, 2 }
  0x33   : > { %v877_v49 = vadd.f32 %v876_v39, %v875_v31  ;;  %v887_v50 = vadd.f32 %v886_v40, %v885_v32  ;;  %v897_v51 = vadd.f32 %v896_v41, %v895_v33  ;;  %v806_v10 = vsel %vm1378_vm12, %v1358_v4, 0.0 }
  0x34   : > { %v840_v53 = vrot.slane %v839_v43, 1  ;;  %v850_v55 = vrot.slane %v849_v44, 1  ;;  %v860_v56 = vrot.slane %v859_v45, 1  ;;  %v869_v57 = vadd.f32 %v868_v46, %v867_v37 }
  0x35   : > { %v878_v59 = vrot.slane %v877_v49, 2  ;;  %v888_v60 = vrot.slane %v887_v50, 2  ;;  %v898_v61 = vrot.slane %v897_v51, 2  ;;  %v807_v20 = vsel %vm1378_vm12, %v1360_v5, 0.0 }
  0x36   : > { %v841_v63 = vadd.f32 %v840_v53, %v839_v43  ;;  %v851_v0 = vadd.f32 %v850_v55, %v849_v44  ;;  %v861_v1 = vadd.f32 %v860_v56, %v859_v45  ;;  %v870_v2 = vrot.slane %v869_v57, 1  ;;  %v904_v56 = vld [vmem:[%s1354_s27 + $0x7] sm:$0x1] }
  0x37   : > { %v879_v7 = vadd.f32 %v878_v59, %v877_v49  ;;  %v889_v8 = vadd.f32 %v888_v60, %v887_v50  ;;  %v899_v9 = vadd.f32 %v898_v61, %v897_v51  ;;  %v808_v4 = vsel %vm1378_vm12, %v1362_v6, 0.0 }
  0x38   : > { %v842_v11 = vadd.f32 %v841_v63, %v833_v48  ;;  %v852_v12 = vadd.f32 %v851_v0, %v844_v54  ;;  %v862_v13 = vadd.f32 %v861_v1, %v854_v58  ;;  %v871_v14 = vadd.f32 %v870_v2, %v869_v57 }
  0x39   : > { %v880_v16 = vrot.slane %v879_v7, 1  ;;  %v890_v17 = vrot.slane %v889_v8, 1  ;;  %v900_v19 = vrot.slane %v899_v9, 1  ;;  %v814_v24 = vmul.f32 %v1400_v42, %v1400_v42 }
  0x3a   : > { %843 = vst [vmem:[%s1354_s27] sm:$0x1] %v842_v11  ;;  %853 = vst [vmem:[%s1354_s27 + $0x1] sm:$0x1] %v852_v12  ;;  %v872_v21 = vadd.f32 %v871_v14, %v864_v3  ;;  %v815_v5 = vmul.f32 %v804_v52, %v804_v52  ;;  %v817_v28 = vmul.f32 %v805_v62, %v805_v62 }
  0x3b   : > { %863 = vst [vmem:[%s1354_s27 + $0x2] sm:$0x1] %v862_v13  ;;  %v881_v25 = vadd.f32 %v880_v16, %v879_v7  ;;  %v891_v26 = vadd.f32 %v890_v17, %v889_v8  ;;  %v901_v27 = vadd.f32 %v900_v19, %v899_v9  ;;  %v819_v29 = vmul.f32 %v806_v10, %v806_v10 }
  0x3c   : > { %873 = vst [vmem:[%s1354_s27 + $0x3] sm:$0x1] %v872_v21  ;;  %v820_v30 = vmul.f32 %v807_v20, %v807_v20  ;;  %v816_v34 = vadd.f32 %v815_v5, %v814_v24  ;;  %v822_v6 = vmul.f32 %v808_v4, %v808_v4  ;;  %v809_v40 = vmul.f32 %v806_v10, %v1400_v42 }
  0x3d   : > { %v882_v31 = vadd.f32 %v881_v25, %v874_v15  ;;  %v892_v32 = vadd.f32 %v891_v26, %v884_v22  ;;  %v902_v33 = vadd.f32 %v901_v27, %v894_v23  ;;  %v810_v41 = vmul.f32 %v807_v20, %v804_v52 }
  0x3e   : > { %v821_v35 = vadd.f32 %v820_v30, %v819_v29  ;;  %v818_v36 = vadd.f32 %v817_v28, %v816_v34  ;;  %v812_v44 = vmul.f32 %v808_v4, %v805_v62 }
  0x3f   : > { %883 = vst [vmem:[%s1354_s27 + $0x4] sm:$0x1] %v882_v31  ;;  %893 = vst [vmem:[%s1354_s27 + $0x5] sm:$0x1] %v892_v32  ;;  %v811_v43 = vadd.f32 %v810_v41, %v809_v40 }
  0x40   : > { %903 = vst [vmem:[%s1354_s27 + $0x6] sm:$0x1] %v902_v33  ;;  %v823_v37 = vadd.f32 %v822_v6, %v821_v35 }
  0x41   : > { %v813_v45 = vadd.f32 %v812_v44, %v811_v43 }
  0x42   : > { %v824_v38 = vmul.f32 %v823_v37, %v818_v36 }
  0x44   : > { %v825_v39 = vmax.f32 %v824_v38, 1e-16 }
  0x46   : > { %1177 = vrsqrt.f32 %v825_v39 }
  0x50   : > { %v1178_v46 = vpop.eup %1177 }
  0x51   : > { %v827_v47 = vmul.f32 %v1178_v46, %v813_v45 }
  0x53   : > { %v828_v48 = vsub.f32 1.0, %v827_v47 }
  0x55   : > { %v829_v49 = vsel %vm1378_vm12, %v828_v48, 0.0 }
  0x56   : > { %v905_v50 = vsel %vm834_vm10, %v829_v49, 0.0 }
  0x57   : > { %v906_v51 = vrot.slane %v905_v50, 4 }
  0x59   : > { %v907_v53 = vadd.f32 %v906_v51, %v905_v50 }
  0x5b   : > { %v908_v54 = vrot.slane %v907_v53, 2 }
  0x5d   : > { %v909_v55 = vadd.f32 %v908_v54, %v907_v53 }
  0x5f   : > { %v910_v42 = vrot.slane %v909_v55, 1 }
  0x61   : > { %v911_v52 = vadd.f32 %v910_v42, %v909_v55 }
  0x63   : > { %v912_v57 = vadd.f32 %v911_v52, %v904_v56 }
  0x65   : > { %913 = vst [vmem:[%s1354_s27 + $0x7] sm:$0x1] %v912_v57 }
  0x66 PF: > { %s18_s9 = sadd.s32 1, %s1217_s9   ;;  %s1481_s27 = sld [smem:[#allocation2_spill]] }
  0x67   : > { %p15_p12 = scmp.ge.s32.totalorder %s18_s9, 6   ;;  %s1482_s28 = sld [smem:[#allocation3_spill]] }
  0x68   : > { %s1483_s29 = sld [smem:[#allocation4_spill]]  ;;  %s1484_s30 = sld [smem:[#allocation5_spill]] }
  0x69   :  { %17 = sbr.rel (!%p15_p12) target bundleno = 4 (0x4), region = 107 }

</bundles_post_ra>
